<compile_context>
chip_gen: v7x
topology: tpu7x:2x2x1
jax: 0.10.0
libtpu: 0.0.40
codegen_flags: <defaults>
</compile_context>

<pallas_src>
import functools

import jax
import jax.numpy as jnp
from jax.experimental import pallas as pl
from jax.experimental.pallas import tpu as pltpu


# ---------------------------------------------------------------------------
# VMEM budgeting (generation-aware).
# ---------------------------------------------------------------------------
def _vmem_budget_bytes():
    cap = None
    try:
        info = pltpu.get_tpu_info()
        cap = getattr(info, "vmem_capacity_bytes", None)
    except Exception:
        cap = None
    if not cap:
        cap = 64 << 20  # conservative default = v7x physical VMEM per TensorCore
    return max(int(cap) - (8 << 20), 16 << 20)  # leave ~8 MiB headroom


def _largest_divisor_tile(hw, max_t):
    """Largest divisor of `hw` that is <= max_t, preferring multiples of 128."""
    max_t = max(1, min(int(max_t), hw))
    best_aligned, best_any = 0, 1
    for t in range(1, max_t + 1):
        if hw % t == 0:
            best_any = t
            if t % 128 == 0:
                best_aligned = t
    return best_aligned if best_aligned else best_any


# ---------------------------------------------------------------------------
# Single-pass fused kernel: pool + FCs + sigmoid + rescale in one HBM pass.
# ---------------------------------------------------------------------------
def _se_fused_kernel(x_ref, wd_ref, bd_ref, wu_ref, bu_ref, o_ref, *,
                     use_mxu, inv_hw):
    # Squeeze: global average pool over H*W (f32 accumulation only inside the
    # reduction; no full-tile f32 copy is kept around).
    pooled = jnp.sum(x_ref[0].astype(jnp.float32), axis=1, keepdims=True) * inv_hw  # (C, 1)

    if use_mxu:
        # Large C*Cr: run the two tiny FCs on the otherwise-idle MXU.
        # wd_ref: (Cr, C), bd_ref: (Cr, 1), wu_ref: (C, Cr), bu_ref: (C, 1), all f32.
        h = jnp.dot(wd_ref[...], pooled, preferred_element_type=jnp.float32)   # (Cr, 1)
        h = jnp.maximum(h + bd_ref[...], 0.0)
        z = jnp.dot(wu_ref[...], h, preferred_element_type=jnp.float32)        # (C, 1)
        z = z + bu_ref[...]
    else:
        # Tiny C*Cr: VPU broadcast-mul + reduce (weights pre-cast to f32 in wrapper).
        # wd_ref: (C, Cr), bd_ref: (1, Cr), wu_ref: (C, Cr), bu_ref: (C, 1).
        h = jnp.sum(pooled * wd_ref[...], axis=0, keepdims=True)               # (1, Cr)
        h = jnp.maximum(h + bd_ref[...], 0.0)
        z = jnp.sum(wu_ref[...] * h, axis=1, keepdims=True)                    # (C, 1)
        z = z + bu_ref[...]

    z = 1.0 / (1.0 + jnp.exp(-z))                                              # sigmoid (EUP)

    # Scale directly from the ref in the native dtype (no f32 tile copy).
    o_ref[0] = x_ref[0] * z.astype(o_ref.dtype)


def _se_single_pass(x2, down_w, down_b, up_w, up_b, *, vmem_limit):
    N, C, HW = x2.shape
    Cr = down_w.shape[0]
    use_mxu = (C * Cr) >= 4096

    if use_mxu:
        wd = down_w.astype(jnp.float32)                   # (Cr, C)  (torch layout)
        bd = down_b.astype(jnp.float32).reshape(Cr, 1)
        wu = up_w.astype(jnp.float32)                     # (C, Cr)
        bu = up_b.astype(jnp.float32).reshape(C, 1)
    else:
        wd = jnp.transpose(down_w.astype(jnp.float32))    # (C, Cr)  (in, out)
        bd = down_b.astype(jnp.float32).reshape(1, Cr)
        wu = up_w.astype(jnp.float32)                     # (C, Cr)  (out, in)
        bu = up_b.astype(jnp.float32).reshape(C, 1)

    kernel = functools.partial(_se_fused_kernel, use_mxu=use_mxu,
                               inv_hw=1.0 / float(HW))

    return pl.pallas_call(
        kernel,
        out_shape=jax.ShapeDtypeStruct((N, C, HW), x2.dtype),
        grid_spec=pltpu.PrefetchScalarGridSpec(
            num_scalar_prefetch=0,
            grid=(N,),
            in_specs=[
                pl.BlockSpec((1, C, HW), lambda n: (n, 0, 0)),
                pl.BlockSpec(wd.shape, lambda n: (0, 0)),
                pl.BlockSpec(bd.shape, lambda n: (0, 0)),
                pl.BlockSpec(wu.shape, lambda n: (0, 0)),
                pl.BlockSpec(bu.shape, lambda n: (0, 0)),
            ],
            out_specs=pl.BlockSpec((1, C, HW), lambda n: (n, 0, 0)),
        ),
        compiler_params=pltpu.CompilerParams(
            dimension_semantics=("parallel",),
            vmem_limit_bytes=vmem_limit,
        ),
    )(x2, wd, bd, wu, bu)


# ---------------------------------------------------------------------------
# Two-pass fallback (large tiles): pass 1 pooled sums, z in XLA, pass 2 scale.
# ---------------------------------------------------------------------------
def _pool_partial_kernel(x_ref, psum_ref):
    # x_ref: (1, C, T); psum_ref: (1, C, nT) f32, resident across the hw axis.
    j = pl.program_id(1)
    partial = jnp.sum(x_ref[0].astype(jnp.float32), axis=1, keepdims=True)  # (C, 1)
    psum_ref[0, :, pl.ds(j, 1)] = partial


def _scale_kernel(x_ref, z_ref, o_ref):
    # x_ref: (1, C, T) native dtype; z_ref: (1, C, 1) f32 gate.
    o_ref[0] = x_ref[0] * z_ref[0].astype(o_ref.dtype)


def _se_two_pass(x2, down_w, down_b, up_w, up_b, *, budget, force_small_tiles):
    N, C, HW = x2.shape
    itemsize = x2.dtype.itemsize

    # Per-step VMEM ~ 3 buffers of the x tile (Buffered(3)) + 2 of the out tile.
    max_t = max(1, budget // (6 * C * itemsize))
    if force_small_tiles:
        max_t = min(max_t, max(1, HW // 4))
    T = _largest_divisor_tile(HW, max_t)
    nT = HW // T

    # --- Pass 1: HW-tiled pooled partial sums (N parallel, hw reduction). ---
    psum = pl.pallas_call(
        _pool_partial_kernel,
        out_shape=jax.ShapeDtypeStruct((N, C, nT), jnp.float32),
        grid_spec=pltpu.PrefetchScalarGridSpec(
            num_scalar_prefetch=0,
            grid=(N, nT),
            in_specs=[pl.BlockSpec((1, C, T), lambda n, j: (n, 0, j))],
            out_specs=pl.BlockSpec((1, C, nT), lambda n, j: (n, 0, 0)),
        ),
        compiler_params=pltpu.CompilerParams(
            dimension_semantics=("parallel", "arbitrary"),
            vmem_limit_bytes=budget,
        ),
    )(x2)

    # --- Gate computation in plain XLA (only N*C work). ---
    pooled = jnp.sum(psum, axis=2) * (1.0 / float(HW))                 # (N, C) f32
    wd = down_w.astype(jnp.float32)
    bd = down_b.astype(jnp.float32)
    wu = up_w.astype(jnp.float32)
    bu = up_b.astype(jnp.float32)
    h = jnp.maximum(pooled @ wd.T + bd, 0.0)                           # (N, Cr)
    z = 1.0 / (1.0 + jnp.exp(-(h @ wu.T + bu)))                        # (N, C)
    z3 = z.reshape(N, C, 1)

    # --- Pass 2: HW-tiled channel-wise rescale; both grid axes parallel. ---
    x_spec_kwargs = {}
    if nT >= 3:
        x_spec_kwargs["pipeline_mode"] = pl.Buffered(3)
    out2 = pl.pallas_call(
        _scale_kernel,
        out_shape=jax.ShapeDtypeStruct((N, C, HW), x2.dtype),
        grid_spec=pltpu.PrefetchScalarGridSpec(
            num_scalar_prefetch=0,
            grid=(N, nT),
            in_specs=[
                pl.BlockSpec((1, C, T), lambda n, j: (n, 0, j), **x_spec_kwargs),
                pl.BlockSpec((1, C, 1), lambda n, j: (n, 0, 0)),
            ],
            out_specs=pl.BlockSpec((1, C, T), lambda n, j: (n, 0, j)),
        ),
        compiler_params=pltpu.CompilerParams(
            dimension_semantics=("parallel", "parallel"),
            vmem_limit_bytes=budget,
        ),
    )(x2, z3)
    return out2


# ---------------------------------------------------------------------------
# Public entry point.
# ---------------------------------------------------------------------------
def se_block(x, down_w, down_b, up_w, up_b, *, force_two_pass=False):
    """Fused SEBlock forward.

    Args:
      x:      (N, C, H, W) activations (NCHW, as in the PyTorch module).
      down_w: (Cr, C) 1x1-conv weight of the squeeze FC (torch layout, k=1 squeezed).
      down_b: (Cr,)   squeeze bias.
      up_w:   (C, Cr) 1x1-conv weight of the excite FC.
      up_b:   (C,)    excite bias.
      force_two_pass: force the HW-tiled two-pass fallback (testing / tiny-VMEM).
    Returns:
      (N, C, H, W) = x * sigmoid(up(relu(down(mean_{H,W}(x))))).
    """
    N, C, H, W = x.shape
    Cr = down_w.shape[0]
    HW = H * W
    itemsize = x.dtype.itemsize

    x2 = x.reshape(N, C, HW)  # lane axis = H*W (lane-dense for HW >= 128)

    budget = _vmem_budget_bytes()
    tile_bytes = C * HW * itemsize
    weight_bytes = (2 * C * Cr + C + Cr) * 4  # f32 weights + biases
    # in + out tile, each double-buffered, + double-buffered weights + margin.
    single_pass_need = 4 * tile_bytes + 2 * weight_bytes + (4 << 20)

    if (not force_two_pass) and single_pass_need <= budget:
        out2 = _se_single_pass(x2, down_w, down_b, up_w, up_b, vmem_limit=budget)
    else:
        out2 = _se_two_pass(x2, down_w, down_b, up_w, up_b,
                            budget=budget, force_small_tiles=force_two_pass)
    return out2.reshape(N, C, H, W)


# ---------------------------------------------------------------------------
# Self-test.
# ---------------------------------------------------------------------------
if __name__ == "__main__":
    def _ref_se(x, dw, db, uw, ub):
        xf = x.astype(jnp.float32)
        pooled = jnp.mean(xf, axis=(2, 3))                                    # (N, C)
        h = jnp.maximum(pooled @ dw.astype(jnp.float32).T + db.astype(jnp.float32), 0.0)
        z = 1.0 / (1.0 + jnp.exp(-(h @ uw.astype(jnp.float32).T + ub.astype(jnp.float32))))
        return xf * z[:, :, None, None]

    def _make_inputs(key, N, C, Cr, H, W, act_dtype):
        k_x, k_dw, k_db, k_uw, k_ub = jax.random.split(key, 5)
        x = jax.random.normal(k_x, (N, C, H, W), dtype=jnp.float32).astype(act_dtype)
        dw = jax.random.normal(k_dw, (Cr, C), dtype=jnp.float32) * 0.5
        db = jax.random.normal(k_db, (Cr,), dtype=jnp.float32) * 0.1
        uw = jax.random.normal(k_uw, (C, Cr), dtype=jnp.float32) * 0.5
        ub = jax.random.normal(k_ub, (C,), dtype=jnp.float32) * 0.1
        return x, dw, db, uw, ub

    key = jax.random.PRNGKey(0)
    k_a, k_b, k_c = jax.random.split(key, 3)

    # (a) Main small config: single-pass, VPU FC path, f32.
    x, dw, db, uw, ub = _make_inputs(k_a, 2, 4, 2, 16, 16, jnp.float32)
    out = jax.block_until_ready(se_block(x, dw, db, uw, ub))
    ref = _ref_se(x, dw, db, uw, ub)
    assert out.shape == x.shape and out.dtype == x.dtype
    assert jnp.allclose(out, ref, rtol=1e-5, atol=1e-5), (
        "single-pass VPU path: max abs err %e" % float(jnp.max(jnp.abs(out - ref))))

    # (b) Larger channels, bf16 activations: single-pass, MXU FC path +
    #     native-dtype (bf16) rescale.  Loose tolerance for bf16/MXU rounding.
    xb, dwb, dbb, uwb, ubb = _make_inputs(k_b, 1, 256, 64, 16, 16, jnp.bfloat16)
    outb = jax.block_until_ready(se_block(xb, dwb, dbb, uwb, ubb))
    refb = _ref_se(xb, dwb, dbb, uwb, ubb)
    assert outb.shape == xb.shape and outb.dtype == xb.dtype
    assert jnp.allclose(outb.astype(jnp.float32), refb, rtol=6e-2, atol=6e-2), (
        "single-pass MXU path: max abs err %e"
        % float(jnp.max(jnp.abs(outb.astype(jnp.float32) - refb))))

    # (c) Forced two-pass HW-tiled fallback (pool kernel + XLA gate + scale kernel).
    xc, dwc, dbc, uwc, ubc = _make_inputs(k_c, 2, 4, 2, 32, 32, jnp.float32)
    outc = jax.block_until_ready(se_block(xc, dwc, dbc, uwc, ubc, force_two_pass=True))
    refc = _ref_se(xc, dwc, dbc, uwc, ubc)
    assert outc.shape == xc.shape and outc.dtype == xc.dtype
    assert jnp.allclose(outc, refc, rtol=1e-5, atol=1e-5), (
        "two-pass path: max abs err %e" % float(jnp.max(jnp.abs(outc - refc))))

    print("KERNEL_OK")
</pallas_src>

<mosaic_0001>
module attributes {stable_mosaic.version = 11 : i64} {
  func.func @_se_fused_kernel(%arg0: i32, %arg1: memref<1x4x256xf32, #tpu.memory_space<vmem>>, %arg2: memref<4x2xf32, #tpu.memory_space<vmem>>, %arg3: memref<1x2xf32, #tpu.memory_space<vmem>>, %arg4: memref<4x2xf32, #tpu.memory_space<vmem>>, %arg5: memref<4x1xf32, #tpu.memory_space<vmem>>, %arg6: memref<1x4x256xf32, #tpu.memory_space<vmem>>) attributes {dimension_semantics = [#tpu.dimension_semantics<parallel>], iteration_bounds = array<i64: 2>, scalar_prefetch = 0 : i64, scratch_operands = 0 : i64, tpu.core_type = #tpu.core_type<tc>, window_params = [{transform_indices = @transform_0, window_bounds = array<i64: 1, 4, 256>}, {pipeline_mode = #tpu.pipeline_mode<synchronous>, transform_indices = @transform_1, window_bounds = array<i64: 4, 2>}, {pipeline_mode = #tpu.pipeline_mode<synchronous>, transform_indices = @transform_2, window_bounds = array<i64: 1, 2>}, {pipeline_mode = #tpu.pipeline_mode<synchronous>, transform_indices = @transform_3, window_bounds = array<i64: 4, 2>}, {pipeline_mode = #tpu.pipeline_mode<synchronous>, transform_indices = @transform_4, window_bounds = array<i64: 4, 1>}, {transform_indices = @transform_5, window_bounds = array<i64: 1, 4, 256>}]} {
    %c0 = arith.constant 0 : index
    %c0_0 = arith.constant 0 : index
    %c0_1 = arith.constant 0 : index
    %0 = vector.load %arg1[%c0, %c0_0, %c0_1] : memref<1x4x256xf32, #tpu.memory_space<vmem>>, vector<1x4x256xf32>
    %1 = vector.shape_cast %0 : vector<1x4x256xf32> to vector<4x256xf32>
    %cst = arith.constant dense<0.000000e+00> : vector<4xf32>
    %2 = vector.multi_reduction <add>, %1, %cst [1] : vector<4x256xf32> to vector<4xf32>
    %3 = vector.shape_cast %2 : vector<4xf32> to vector<4x1xf32>
    %cst_2 = arith.constant 3.906250e-03 : f32
    %4 = vector.broadcast %cst_2 : f32 to vector<4x1xf32>
    %5 = arith.mulf %3, %4 : vector<4x1xf32>
    %c0_3 = arith.constant 0 : index
    %c0_4 = arith.constant 0 : index
    %6 = vector.load %arg2[%c0_3, %c0_4] : memref<4x2xf32, #tpu.memory_space<vmem>>, vector<4x2xf32>
    %7 = vector.broadcast %5 : vector<4x1xf32> to vector<4x2xf32>
    %8 = arith.mulf %7, %6 : vector<4x2xf32>
    %cst_5 = arith.constant dense<0.000000e+00> : vector<2xf32>
    %9 = vector.multi_reduction <add>, %8, %cst_5 [0] : vector<4x2xf32> to vector<2xf32>
    %10 = vector.shape_cast %9 : vector<2xf32> to vector<1x2xf32>
    %c0_6 = arith.constant 0 : index
    %c0_7 = arith.constant 0 : index
    %11 = vector.load %arg3[%c0_6, %c0_7] : memref<1x2xf32, #tpu.memory_space<vmem>>, vector<1x2xf32>
    %12 = arith.addf %10, %11 : vector<1x2xf32>
    %cst_8 = arith.constant 0.000000e+00 : f32
    %13 = vector.broadcast %cst_8 : f32 to vector<1x2xf32>
    %14 = arith.maximumf %12, %13 : vector<1x2xf32>
    %c0_9 = arith.constant 0 : index
    %c0_10 = arith.constant 0 : index
    %15 = vector.load %arg4[%c0_9, %c0_10] : memref<4x2xf32, #tpu.memory_space<vmem>>, vector<4x2xf32>
    %16 = vector.broadcast %14 : vector<1x2xf32> to vector<4x2xf32>
    %17 = arith.mulf %15, %16 : vector<4x2xf32>
    %cst_11 = arith.constant dense<0.000000e+00> : vector<4xf32>
    %18 = vector.multi_reduction <add>, %17, %cst_11 [1] : vector<4x2xf32> to vector<4xf32>
    %19 = vector.shape_cast %18 : vector<4xf32> to vector<4x1xf32>
    %c0_12 = arith.constant 0 : index
    %c0_13 = arith.constant 0 : index
    %20 = vector.load %arg5[%c0_12, %c0_13] : memref<4x1xf32, #tpu.memory_space<vmem>>, vector<4x1xf32>
    %21 = arith.addf %19, %20 : vector<4x1xf32>
    %cst_14 = arith.constant 0.000000e+00 : f32
    %22 = vector.broadcast %cst_14 : f32 to vector<4x1xf32>
    %23 = arith.subf %22, %21 : vector<4x1xf32>
    %24 = math.exp %23 : vector<4x1xf32>
    %cst_15 = arith.constant 1.000000e+00 : f32
    %25 = vector.broadcast %cst_15 : f32 to vector<4x1xf32>
    %26 = arith.addf %25, %24 : vector<4x1xf32>
    %cst_16 = arith.constant 1.000000e+00 : f32
    %27 = vector.broadcast %cst_16 : f32 to vector<4x1xf32>
    %28 = arith.divf %27, %26 : vector<4x1xf32>
    %c0_17 = arith.constant 0 : index
    %c0_18 = arith.constant 0 : index
    %c0_19 = arith.constant 0 : index
    %29 = vector.load %arg1[%c0_17, %c0_18, %c0_19] : memref<1x4x256xf32, #tpu.memory_space<vmem>>, vector<1x4x256xf32>
    %30 = vector.shape_cast %29 : vector<1x4x256xf32> to vector<4x256xf32>
    %31 = vector.broadcast %28 : vector<4x1xf32> to vector<4x256xf32>
    %32 = arith.mulf %30, %31 : vector<4x256xf32>
    %c0_20 = arith.constant 0 : index
    %c0_21 = arith.constant 0 : index
    %c0_22 = arith.constant 0 : index
    %33 = vector.load %arg6[%c0_20, %c0_21, %c0_22] : memref<1x4x256xf32, #tpu.memory_space<vmem>>, vector<1x4x256xf32>
    %34 = vector.shape_cast %33 : vector<1x4x256xf32> to vector<4x256xf32>
    %35 = vector.shape_cast %32 : vector<4x256xf32> to vector<1x4x256xf32>
    tpu.vector_store %arg6[%c0_20, %c0_21, %c0_22], %35 {strides = array<i32>} : memref<1x4x256xf32, #tpu.memory_space<vmem>>, vector<1x4x256xf32>,
    return
  }
  func.func @transform_0(%arg0: i32) -> (i32, i32, i32) {
    %c0_i32 = arith.constant 0 : i32
    %c0_i32_0 = arith.constant 0 : i32
    %c0_i32_1 = arith.constant 0 : i32
    return %arg0, %c0_i32, %c0_i32_0 : i32, i32, i32
  }
  func.func @transform_1(%arg0: i32) -> (i32, i32) {
    %c0_i32 = arith.constant 0 : i32
    %c0_i32_0 = arith.constant 0 : i32
    %c0_i32_1 = arith.constant 0 : i32
    return %c0_i32, %c0_i32_0 : i32, i32
  }
  func.func @transform_2(%arg0: i32) -> (i32, i32) {
    %c0_i32 = arith.constant 0 : i32
    %c0_i32_0 = arith.constant 0 : i32
    %c0_i32_1 = arith.constant 0 : i32
    return %c0_i32, %c0_i32_0 : i32, i32
  }
  func.func @transform_3(%arg0: i32) -> (i32, i32) {
    %c0_i32 = arith.constant 0 : i32
    %c0_i32_0 = arith.constant 0 : i32
    %c0_i32_1 = arith.constant 0 : i32
    return %c0_i32, %c0_i32_0 : i32, i32
  }
  func.func @transform_4(%arg0: i32) -> (i32, i32) {
    %c0_i32 = arith.constant 0 : i32
    %c0_i32_0 = arith.constant 0 : i32
    %c0_i32_1 = arith.constant 0 : i32
    return %c0_i32, %c0_i32_0 : i32, i32
  }
  func.func @transform_5(%arg0: i32) -> (i32, i32, i32) {
    %c0_i32 = arith.constant 0 : i32
    %c0_i32_0 = arith.constant 0 : i32
    %c0_i32_1 = arith.constant 0 : i32
    return %arg0, %c0_i32, %c0_i32_0 : i32, i32, i32
  }
}

</mosaic_0001>

<bundles_post_ra>
// kernel: tpu_custom_call.1
= control target key start
LH: loop header
LB: loop body
LE: loop exit
PB: predicated region body
PF: predicated region fallthrough
CT: control target
= control target key end

     0   :  { %10 = vsyncpa [#allocation3], 0  ;;  %s625_s0 = inlined_call_operand.vmem [shape: f32[2,4,256], index: 0, kind: input, shape index: {}]   ;;  %s626_s1 = inlined_call_operand.vmem [shape: f32[4,2], index: 1, kind: input, shape index: {}]   ;;  %s627_s2 = inlined_call_operand.vmem [shape: f32[1,2], index: 2, kind: input, shape index: {}]   ;;  %s628_s3 = inlined_call_operand.vmem [shape: f32[4,2], index: 3, kind: input, shape index: {}]   ;;  %s629_s4 = inlined_call_operand.vmem [shape: f32[4,1], index: 4, kind: input, shape index: {}]   ;;  %s630_s5 = inlined_call_operand.hbm [shape: f32[2,4,256], index: 5, kind: output, shape index: {}]  }
   0x1   :  { %12 = vsyncpa [#allocation3 + $0x1], 0  ;;  %s511_s18 = smov 0   ;;  %s513_s19 = smov 0  }
   0x2   :  { %s515_s20 = smov 0   ;;  %s517_s21 = smov 0  }
   0x3 LB: > { %s532_s22 = sadd.s32 4294967295, %s476_s21   ;;  %s352_s23 = sadd.s32 4294967294, %s476_s21   ;;  %s476_s21 = sphi %s517_s21, %s636_s21   ;;  %s472_s20 = sphi %s515_s20, %s635_s20   ;;  %s468_s19 = sphi %s513_s19, %s634_s19   ;;  %s464_s18 = sphi %s511_s18, %s633_s18  }
   0x4   : > { %s536_s24 = sadd.s32 1, %s476_s21   ;;  %s135_s25 = sadd.s32 1, %s472_s20 }
   0x5   : > { %s132_s26 = ssub.s32 %s476_s21, %s536_s24  ;;  %p145_p0 = scmp.ne.s32.totalorder %s472_s20, %s468_s19 }
   0x6   : > { %p133_p1 = scmp.eq.s32.totalorder %s132_s26, 0  ;;  %p146_p2 = scmp.eq.s32.totalorder %s532_s22, 1 }
   0x7   : > { %p151_p3 = scmp.ne.s32.totalorder %s468_s19, %s464_s18  ;;  %p152_p4 = scmp.eq.s32.totalorder %s352_s23, 1 }
   0x8   : > { %s547_s27 = scalar_select %p133_p1, %s472_s20, %s135_s25  }
   0x9   : > { %p549_p5 = por %p146_p2, %p145_p0  ;;  %p553_p6 = por %p152_p4, %p151_p3 }
   0xa   : > { %p355_p7 = scmp.ge.s32.totalorder %s476_s21, 1  ;;  %p190_p8 = scmp.lt.s32.totalorder %s476_s21, 3 }
   0xc   : > { %p191_p9 = pnand %p355_p7, %p190_p8 }
   0xd   : > { %p218_p10 = scmp.lt.s32.totalorder (!%p191_p9), %s532_s22, 1  ;;  %vm227_vm0 = vcmask (!%p191_p9), 1043456   ;;  %v234_v5 = vld [vmem:[%s626_s1] sm:$0xf] (!%p191_p9)  ;;  %vm236_vm1 = vcmask (!%p191_p9), 11264   ;;  %v248_v13 = vlaneseq (!%p191_p9)  ;;  %v478_v26 = vmov (!%p191_p9), 0  }
   0xe   : > { %194 = sbr.rel (%p191_p9) target bundleno = 517 (0x205), region = 40  ;;  %v244_v17 = vld [vmem:[%s627_s2] sm:$0x1] (!%p191_p9)  ;;  %407 = vset.pattern.permute.xlu1 (!%p191_p9), %v478_v26  ;;  %408 = vset.pattern.permute.xlu0 (!%p191_p9), %v478_v26  ;;  %v479_v35 = vmov (!%p191_p9), 839922192   ;;  %s215_s23 = sand.u32 (!%p191_p9), 1, %s468_s19  }
   0xf   : > { %v249_v16 = vshrl.u32 (!%p191_p9), %v248_v13, 7  ;;  %v247_v22 = vld [vmem:[%s628_s3] sm:$0xf] (!%p191_p9)  ;;  %v269_v36 = vunpack.c.l.s4 (!%p191_p9), %v479_v35  ;;  %s356_s25 = sshll.u32 (!%p191_p9), %s215_s23, 3  ;;  %s365_s26 = sshll.u32 (!%p191_p9), %s532_s22, 7 }
  0x10   : > { %v256_v27 = vld [vmem:[%s629_s4] sm:$0xf] (!%p191_p9)  ;;  %s279_s10 = scalar_lea.sflag (!%p191_p9), [#allocation3], %s215_s23 }
  0x11   : > { %v250_v20 = vsub.s32 (!%p191_p9), 0, %v249_v16  ;;  %v270_v37 = vunpack.c.0.s8 (!%p191_p9), %v269_v36 }
  0x13   : > { %v273_v38 = vsub.s32 (!%p191_p9), %v270_v37, %v249_v16 }
  0x15   : > { %s219_s30 = scalar_select %p218_p10, %s532_s22, 1 }
  0x16   : > { %s480_s22 = smov [#allocation2]  }
  0x17   : > { %s364_s6 = sshll.u32 %s219_s30, 3  ;;  %s217_s30 = scalar_lea.vmem [#allocation2], %s356_s25 }
  0x18   : > { %s222_s9 = scalar_lea.vmem %s625_s0, %s364_s6  ;;  %s293_s6 = sshll.u32 %s217_s30, 4  ;;  %s585_s6 = int_to_ptr.vmem [resolvable:$true] %s293_s6 }
  0x19   : > { %v223_v0 = vld [vmem:[%s222_s9] sm:$0xff]  ;;  %s583_s9 = scalar_lea.hbm %s630_s5, %s365_s26  ;;  %s414_s11 = scalar_lea.vmem %s585_s6, 128 }
  0x1a   : > { %v225_v1 = vcombine.high %v223_v0, %v223_v0  ;;  %v228_v2 = vsel %vm227_vm0, %v223_v0, 0.0  ;;  %p415_p11 = scmp.ne.s32.totalorder %s585_s6, %s414_s11  ;;  %s418_s12 = sshll.u32 %s480_s22, 4  ;;  %s419_s12 = int_to_ptr.vmem [resolvable:$false] %s418_s12 }
  0x1b   : > { %s420_s13 = scalar_lea.vmem %s419_s12, 256  ;;  %p421_p0 = scmp.lt.s32.totalorder %s585_s6, %s419_s12 }
  0x1c   : > { %v229_v3 = vsel %vm227_vm0, %v225_v1, 0.0  ;;  %p416_p12 = pnand %p415_p11, %p549_p5  ;;  %p422_p1 = scmp.lt.s32.totalorder %s420_s13, %s414_s11 }
  0x1d   : > { %v230_v4 = vadd.f32 %v229_v3, %v228_v2 }
  0x1e   : > { %p417_p13 = pneg %p416_p12  ;;  %p423_p2 = por %p422_p1, %p421_p0 }
  0x1f   : > { %231 = vadd.xlane.f32.xlu0 %v230_v4 }
  0x20   : > { %p424_p3 = pnand %p423_p2, %p417_p13 }
  0xac   : > { %v232_v6 = vpop.xlane.xlu0 %231 }
  0xad   : > { %v233_v7 = vmul.f32 0.00390625, %v232_v6 }
  0xaf   : > { %v235_v8 = vmul.f32 %v234_v5, %v233_v7 }
  0xb1   : > { %v237_v9 = vsel %vm236_vm1, %v235_v8, 0.0 }
  0xb2   : > { %v238_v10 = vrot.slane %v237_v9, 4 }
  0xb4   : > { %v239_v11 = vadd.f32 %v238_v10, %v237_v9 }
  0xb6   : > { %v240_v12 = vrot.slane %v239_v11, 2 }
  0xb8   : > { %v241_v14 = vadd.f32 %v240_v12, %v239_v11 }
  0xba   : > { %v242_v15 = vrot.slane %v241_v14, 1 }
  0xbc   : > { %v243_v18 = vadd.f32 %v242_v15, %v241_v14 }
  0xbe   : > { %v245_v19 = vadd.f32 %v244_v17, %v243_v18 }
  0xc0   : > { %v246_v21 = vmax.f32 %v245_v19, 0.0 }
  0xc2   : > { %v251_v23 = vrot.slane %v246_v21, %v250_v20 }
  0xc4   : > { %v252_v24 = vmul.f32 %v251_v23, %v247_v22 }
  0xc6   : > { %v253_v25 = vsel %vm236_vm1, %v252_v24, 0.0 }
  0xc7   : > { %254 = vadd.xlane.f32.xlu0 %v253_v25 }
 0x154   : > { %v255_v28 = vpop.xlane.xlu0 %254 }
 0x155   : > { %v257_v29 = vadd.f32 %v256_v27, %v255_v28 }
 0x157   : > { %v258_v30 = vsub.f32 0.0, %v257_v29 }
 0x159   : > { %v259_v31 = vmul.f32 1.442695, %v258_v30 }
 0x15b   : > { %410 = vpow2.f32 %v259_v31 }
 0x165   : > { %v411_v32 = vpop.eup %410 }
 0x166   : > { %v261_v33 = vadd.f32 1.0, %v411_v32 }
 0x168   : > { %412 = vrcp.f32 %v261_v33 }
 0x172   : > { %v413_v34 = vpop.eup %412 }
 0x173   : > { %266 = vperm.xlu1 %407, %v413_v34  }
 0x1f2   : > { %v267_v39 = vpop.permute.xlu1 %266 }
 0x1f3   : > { %v274_v40 = vrot.slane %v267_v39, %v273_v38 }
 0x1f5   : > { %v276_v41 = vmul.f32 %v274_v40, %v223_v0 }
 0x1f7   : > { %277 = vst [vmem:[%s217_s30] sm:$0xff] %v276_v41 }
 0x1f8   : > { %427 = shalt.err (!%p424_p3)
}
 0x1f9   : > { %s428_s14 = scalar_lea.hbm %s583_s9, 128  ;;  %s432_s17 = scalar_lea.hbm %s630_s5, 256 }
 0x1fa   : > { %p429_p4 = scmp.ne.s32.totalorder %s583_s9, %s428_s14  ;;  %p433_p9 = scmp.lt.u32.totalorder %s583_s9, %s630_s5 }
 0x1fb   : > { %p434_p10 = scmp.lt.u32.totalorder %s432_s17, %s428_s14  ;;  %p436_p12 = scmp.lt.u32.totalorder %s428_s14, %s583_s9 }
 0x1fc   : > { %p430_p7 = pnand %p429_p4, %p549_p5 }
 0x1fd   : > { %p435_p11 = por %p434_p10, %p433_p9 }
 0x1fe   : > { %p431_p8 = pneg %p430_p7 }
 0x1ff   : > { %p437_p13 = por %p436_p12, %p435_p11 }
 0x201   : > { %p438_p0 = pnand %p437_p13, %p431_p8 }
 0x203   : > { %441 = shalt.err (!%p438_p0)
}
 0x204   : > { %366 = dma.vmem_to_hbm [thread:$0]  (%p549_p5), %s585_s6, 128, %s583_s9, %s279_s10  }
 0x205 PF: > { %p372_p1 = scmp.ge.s32.totalorder %s476_s21, 2  ;;  %s305_s26 = sand.u32 1, %s464_s18  }
 0x206   : > { %s306_s30 = scalar_lea.sflag [#allocation3], %s305_s26 }
 0x207   : > { %p369_p2 = pnand %p372_p1, %p553_p6 }
 0x209   : > { %459 = dma.done.wait (!%p369_p2), %s306_s30, 128  }
 0x20a   : > { %461 = vsyncadd (!%p369_p2), %s306_s30, 4294967168  ;;  %p15_p3 = scmp.ge.s32.totalorder %s536_s24, 4   ;;  %s633_s18 = smov %s468_s19 }
 0x20b   : > { %s634_s19 = smov %s472_s20  ;;  %s635_s20 = smov %s547_s27 }
 0x20c   : > { %s636_s21 = smov %s536_s24  ;;  %17 = sbr.rel (!%p15_p3) target bundleno = 3 (0x3), region = 75 }
 0x213   :  { %311 = vsyncpa [#allocation3], 1 }
 0x214   :  { %313 = vsyncpa [#allocation3 + $0x1], 1 }

</bundles_post_ra>
